<compile_context>
chip_gen: v7x
topology: tpu7x:2x2x1
jax: 0.10.0
libtpu: 0.0.40
codegen_flags: <defaults>
</compile_context>

<pallas_src>
import functools

import jax
import jax.numpy as jnp
from jax import lax
from jax.experimental import pallas as pl
from jax.experimental.pallas import tpu as pltpu


def _mean_kernel_inplace(x_ref, o_ref, *, n_s_steps, ts, seq_len, mask_tail):
    """float32 path: accumulate directly into the resident (1, tn) output block."""
    s = pl.program_id(1)

    x = x_ref[...]
    if mask_tail:
        # Narrow (ts, 1) predicate; only the select is full-width.
        seq_ids = s * ts + lax.broadcasted_iota(jnp.int32, (ts, 1), 0)
        x = jnp.where(seq_ids < seq_len, x, 0.0)
    partial = jnp.sum(x, axis=0, keepdims=True)

    @pl.when(s == 0)
    def _():
        o_ref[...] = jnp.zeros_like(o_ref)

    o_ref[...] += partial

    @pl.when(s == n_s_steps - 1)
    def _():
        o_ref[...] = o_ref[...] * (1.0 / seq_len)


def _mean_kernel_acc(x_ref, o_ref, acc_ref, *, n_s_steps, ts, seq_len, mask_tail):
    """bf16 / low-precision path: accumulate in an f32 VMEM scratch."""
    s = pl.program_id(1)

    @pl.when(s == 0)
    def _():
        acc_ref[...] = jnp.zeros_like(acc_ref)

    x = x_ref[...].astype(jnp.float32)
    if mask_tail:
        seq_ids = s * ts + lax.broadcasted_iota(jnp.int32, (ts, 1), 0)
        x = jnp.where(seq_ids < seq_len, x, 0.0)
    acc_ref[...] += jnp.sum(x, axis=0, keepdims=True)

    @pl.when(s == n_s_steps - 1)
    def _():
        o_ref[...] = (acc_ref[...] * (1.0 / seq_len)).astype(o_ref.dtype)


def _pick_tile(dim, align, target):
    """Largest multiple of `align` that divides `dim` and is <= target.

    If `dim` is not align-aligned at all, the BlockSpec must use the full extent.
    """
    if dim % align != 0:
        return dim
    cand = (min(target, dim) // align) * align
    while cand >= align:
        if dim % cand == 0:
            return cand
        cand -= align
    return dim


def _pick_seq_tile(S, sublane, ts_target):
    """Sequence tile: prefer an exact divisor of S (no tail mask)."""
    target = max(ts_target, sublane)
    if S <= target:
        return S, False                      # whole sequence in one block
    if S % sublane == 0:
        return _pick_tile(S, sublane, target), False  # dividing tile, no mask
    ts = max((target // sublane) * sublane, sublane)  # non-dividing: mask tail
    return ts, (S % ts) != 0


def mean_embedding(inputs, *, ts_target=64):
    """Pallas equivalent of MeanEmbedding.forward: inputs.mean(0). inputs: (S, B, H)."""
    S, B, H = inputs.shape
    dtype = inputs.dtype
    itemsize = jnp.dtype(dtype).itemsize
    BH = B * H

    # Flatten (B, H) into a single lane axis: long contiguous DMA runs,
    # lane-dense output tiles for any B.
    x = inputs.reshape(S, BH)

    # Sublane alignment depends on dtype packing (8 f32 / 16 bf16 / 32 int8-fp8).
    sublane = {4: 8, 2: 16, 1: 32}.get(itemsize, 8)

    # Generation-aware VMEM sizing (v7x = 64 MiB, v5e/v6e = 128 MiB physical).
    try:
        vmem_cap = int(pltpu.get_tpu_info().vmem_capacity_bytes)
    except Exception:
        vmem_cap = 64 << 20  # conservative fallback (safe on all generations)

    ts, mask_tail = _pick_seq_tile(S, sublane, ts_target)
    n_s = pl.cdiv(S, ts)

    # ~1/8 of physical VMEM per input block (2x input bufs + output stay well
    # under the scoped limit): ~8 MiB blocks on v7x, ~16 MiB on v5e/v6e.
    block_budget = max(vmem_cap // 8, 4 << 20)
    tn_target = max(block_budget // max(ts * itemsize, 1), 128)
    tn = _pick_tile(BH, 128, tn_target)

    # Megacore (v7x): make sure the parallel axis has >= 2 tiles when possible.
    if BH // tn < 2 and BH >= 256 and BH % 128 == 0:
        half = _pick_tile(BH, 128, BH // 2)
        if half < BH:
            tn = half

    n_par = BH // tn

    use_scratch = dtype != jnp.float32
    if use_scratch:
        kernel = functools.partial(
            _mean_kernel_acc, n_s_steps=n_s, ts=ts, seq_len=S, mask_tail=mask_tail)
        scratch_shapes = [pltpu.VMEM((1, tn), jnp.float32)]
    else:
        kernel = functools.partial(
            _mean_kernel_inplace, n_s_steps=n_s, ts=ts, seq_len=S, mask_tail=mask_tail)
        scratch_shapes = []

    # VMEM budget: double-buffered input + output (+ f32 scratch), with headroom.
    vmem_need = (2 * ts * tn * itemsize
                 + 2 * tn * itemsize
                 + (tn * 4 if use_scratch else 0))
    vmem_limit = int(min(max(vmem_need + vmem_need // 2 + (1 << 20), 16 << 20),
                         (vmem_cap * 3) // 4))

    cost = pl.CostEstimate(
        flops=S * BH,
        transcendentals=0,
        bytes_accessed=S * BH * itemsize + BH * itemsize,
    )

    out = pl.pallas_call(
        kernel,
        out_shape=jax.ShapeDtypeStruct((1, BH), dtype),
        grid=(n_par, n_s),
        in_specs=[pl.BlockSpec((ts, tn), lambda n, s: (s, n))],
        out_specs=pl.BlockSpec((1, tn), lambda n, s: (0, n)),
        scratch_shapes=scratch_shapes,
        compiler_params=pltpu.CompilerParams(
            dimension_semantics=("parallel", "arbitrary"),
            vmem_limit_bytes=vmem_limit,
        ),
        cost_estimate=cost,
    )(x)

    return out.reshape(B, H)


if __name__ == "__main__":
    key = jax.random.PRNGKey(0)
    # small shapes: seq=8, batch=2, hidden=32
    x = jax.random.normal(key, (8, 2, 32), dtype=jnp.float32)

    out = mean_embedding(x)
    out = jax.block_until_ready(out)
    ref = jnp.mean(x, axis=0)
    assert out.shape == ref.shape, (out.shape, ref.shape)
    assert jnp.allclose(out, ref, atol=1e-5, rtol=1e-5)

    # Exercise the f32-accumulator (scratch) path with bf16 inputs.
    x_bf16 = x.astype(jnp.bfloat16)
    out_bf16 = jax.block_until_ready(mean_embedding(x_bf16))
    ref_bf16 = jnp.mean(x_bf16.astype(jnp.float32), axis=0)
    assert out_bf16.shape == (2, 32)
    assert jnp.allclose(out_bf16.astype(jnp.float32), ref_bf16, atol=1e-2, rtol=1e-2)

    # Exercise a non-dividing sequence length (tail-mask path) at a larger S.
    x_tail = jax.random.normal(key, (67, 2, 32), dtype=jnp.float32)
    out_tail = jax.block_until_ready(mean_embedding(x_tail, ts_target=16))
    assert jnp.allclose(out_tail, jnp.mean(x_tail, axis=0), atol=1e-5, rtol=1e-5)

    print("KERNEL_OK")
</pallas_src>

<mosaic_0001>
module attributes {stable_mosaic.version = 11 : i64} {
  func.func @_mean_kernel_inplace(%arg0: i32, %arg1: i32, %arg2: memref<8x64xf32, #tpu.memory_space<vmem>>, %arg3: memref<1x64xf32, #tpu.memory_space<vmem>>) attributes {dimension_semantics = [#tpu.dimension_semantics<parallel>, #tpu.dimension_semantics<arbitrary>], iteration_bounds = array<i64: 1, 1>, scalar_prefetch = 0 : i64, scratch_operands = 0 : i64, tpu.core_type = #tpu.core_type<tc>, window_params = [{transform_indices = @transform_0, window_bounds = array<i64: 8, 64>}, {transform_indices = @transform_1, window_bounds = array<i64: 1, 64>}]} {
    %c0 = arith.constant 0 : index
    %c0_0 = arith.constant 0 : index
    %0 = vector.load %arg2[%c0, %c0_0] : memref<8x64xf32, #tpu.memory_space<vmem>>, vector<8x64xf32>
    %cst = arith.constant dense<0.000000e+00> : vector<64xf32>
    %1 = vector.multi_reduction <add>, %0, %cst [0] : vector<8x64xf32> to vector<64xf32>
    %2 = vector.shape_cast %1 : vector<64xf32> to vector<1x64xf32>
    %c0_i32 = arith.constant 0 : i32
    %3 = arith.cmpi eq, %arg1, %c0_i32 : i32
    %4 = arith.extui %3 : i1 to i32
    %c0_i32_1 = arith.constant 0 : i32
    %5 = arith.cmpi ne, %4, %c0_i32_1 : i32
    scf.if %5 {
      %cst_8 = arith.constant 0.000000e+00 : f32
      %12 = vector.broadcast %cst_8 : f32 to vector<1x64xf32>
      %c0_9 = arith.constant 0 : index
      %c0_10 = arith.constant 0 : index
      %13 = vector.load %arg3[%c0_9, %c0_10] : memref<1x64xf32, #tpu.memory_space<vmem>>, vector<1x64xf32>
      tpu.vector_store %arg3[%c0_9, %c0_10], %12 {strides = array<i32>} : memref<1x64xf32, #tpu.memory_space<vmem>>, vector<1x64xf32>,
    } else {
    }
    %c0_2 = arith.constant 0 : index
    %c0_3 = arith.constant 0 : index
    %6 = vector.load %arg3[%c0_2, %c0_3] : memref<1x64xf32, #tpu.memory_space<vmem>>, vector<1x64xf32>
    %7 = arith.addf %6, %2 : vector<1x64xf32>
    %c0_4 = arith.constant 0 : index
    %c0_5 = arith.constant 0 : index
    %8 = vector.load %arg3[%c0_4, %c0_5] : memref<1x64xf32, #tpu.memory_space<vmem>>, vector<1x64xf32>
    tpu.vector_store %arg3[%c0_4, %c0_5], %7 {strides = array<i32>} : memref<1x64xf32, #tpu.memory_space<vmem>>, vector<1x64xf32>,
    %c0_i32_6 = arith.constant 0 : i32
    %9 = arith.cmpi eq, %arg1, %c0_i32_6 : i32
    %10 = arith.extui %9 : i1 to i32
    %c0_i32_7 = arith.constant 0 : i32
    %11 = arith.cmpi ne, %10, %c0_i32_7 : i32
    scf.if %11 {
      %c0_8 = arith.constant 0 : index
      %c0_9 = arith.constant 0 : index
      %12 = vector.load %arg3[%c0_8, %c0_9] : memref<1x64xf32, #tpu.memory_space<vmem>>, vector<1x64xf32>
      %cst_10 = arith.constant 1.250000e-01 : f32
      %13 = vector.broadcast %cst_10 : f32 to vector<1x64xf32>
      %14 = arith.mulf %12, %13 : vector<1x64xf32>
      %c0_11 = arith.constant 0 : index
      %c0_12 = arith.constant 0 : index
      %15 = vector.load %arg3[%c0_11, %c0_12] : memref<1x64xf32, #tpu.memory_space<vmem>>, vector<1x64xf32>
      tpu.vector_store %arg3[%c0_11, %c0_12], %14 {strides = array<i32>} : memref<1x64xf32, #tpu.memory_space<vmem>>, vector<1x64xf32>,
    } else {
    }
    return
  }
  func.func @transform_0(%arg0: i32, %arg1: i32) -> (i32, i32) {
    %c0_i32 = arith.constant 0 : i32
    return %arg1, %arg0 : i32, i32
  }
  func.func @transform_1(%arg0: i32, %arg1: i32) -> (i32, i32) {
    %c0_i32 = arith.constant 0 : i32
    %c0_i32_0 = arith.constant 0 : i32
    return %c0_i32, %arg0 : i32, i32
  }
}

</mosaic_0001>

<bundles_post_ra>
// kernel: tpu_custom_call.1
= control target key start
LH: loop header
LB: loop body
LE: loop exit
PB: predicated region body
PF: predicated region fallthrough
CT: control target
= control target key end

     0   :  { %6 = vsyncpa [#allocation3], 0  ;;  %s152_s0 = inlined_call_operand.hbm [shape: f32[8,64], index: 0, kind: input, shape index: {}]   ;;  %s153_s1 = inlined_call_operand.hbm [shape: f32[1,64], index: 1, kind: output, shape index: {}]  }
   0x1   :  { %7 = vsyncpa [#allocation4], 0  ;;  %s112_s6 = smov [#allocation2]   ;;  %s64_s10 = scalar_lea.hbm %s152_s0, 128 }
   0x2   :  { %s14_s7 = sshll.u32 %s112_s6, 4  ;;  %p65_p0 = scmp.ne.s32.totalorder %s152_s0, %s64_s10  ;;  %s15_s7 = int_to_ptr.vmem [resolvable:$true] %s14_s7 }
   0x3   :  { %p68_p1 = scmp.lt.u32.totalorder %s64_s10, %s152_s0 }
   0x5   :  { %p70_p2 = pnand %p68_p1, %p65_p0 }
   0x7   :  { %73 = shalt.err (!%p70_p2)
}
   0x8   :  { %s74_s15 = scalar_lea.vmem %s15_s7, 128  ;;  %p79_p4 = scmp.lt.s32.totalorder %s15_s7, %s15_s7 }
   0x9   :  { %p75_p3 = scmp.ne.s32.totalorder %s15_s7, %s74_s15  ;;  %p80_p5 = scmp.lt.s32.totalorder %s74_s15, %s74_s15 }
   0xb   :  { %p81_p6 = por %p80_p5, %p79_p4 }
   0xd   :  { %p82_p7 = pnand %p81_p6, %p75_p3 }
   0xf   :  { %85 = shalt.err (!%p82_p7)
}
  0x10   :  { %17 = dma.hbm_to_vmem [thread:$0]  %s152_s0, 128, %s15_s7, [#allocation3]  }
  0x11   :  { %108 = dma.done.wait [#allocation3], 128  }
  0x12   :  { %109 = vsyncadd [#allocation3], 4294967168  ;;  %vm34_vm0 = vcmask 516096   ;;  %v113_v0 = vmov 0.0   ;;  %vm22_vm1 = vcmask 523264   ;;  %v21_v1 = vld [vmem:[#allocation2] sm:$0xff] }
  0x13   :  { %35 = vst.msk [vmem:[#allocation5] sm:$0x1] %vm34_vm0, %v113_v0  ;;  %v23_v2 = vsel %vm22_vm1, %v21_v1, 0.0  ;;  %s114_s0 = smov [#allocation5]  }
  0x14   :  { %v24_v3 = vrot.slane %v23_v2, 4  ;;  %s52_s18 = sshll.u32 %s114_s0, 4  ;;  %s53_s18 = int_to_ptr.vmem [resolvable:$true] %s52_s18 }
  0x15   :  { %s86_s19 = scalar_lea.vmem %s53_s18, 16  ;;  %s90_s20 = scalar_lea.vmem %s53_s18, 32 }
  0x16   :  { %v25_v4 = vadd.f32 %v24_v3, %v23_v2  ;;  %p87_p8 = scmp.ne.s32.totalorder %s53_s18, %s86_s19  ;;  %p91_p9 = scmp.lt.s32.totalorder %s53_s18, %s53_s18 }
  0x17   :  { %p92_p10 = scmp.lt.s32.totalorder %s90_s20, %s86_s19 }
  0x18   :  { %v26_v5 = vrot.slane %v25_v4, 2 }
  0x19   :  { %p93_p11 = por %p92_p10, %p91_p9 }
  0x1a   :  { %v27_v6 = vadd.f32 %v26_v5, %v25_v4  ;;  %v36_v8 = vld [vmem:[#allocation5] sm:$0x1] }
  0x1b   :  { %p94_p12 = pnand %p93_p11, %p87_p8 }
  0x1c   :  { %v28_v7 = vrot.slane %v27_v6, 1 }
  0x1e   :  { %v29_v9 = vadd.f32 %v28_v7, %v27_v6 }
  0x20   :  { %v37_v10 = vadd.f32 %v36_v8, %v29_v9 }
  0x22   :  { %39 = vst.msk [vmem:[#allocation5] sm:$0x1] %vm34_vm0, %v37_v10 }
  0x29   :  { %v43_v11 = vld [vmem:[#allocation5] sm:$0x1] }
  0x2a   :  { %v44_v12 = vmul.f32 0.125, %v43_v11 }
  0x2c   :  { %45 = vst.msk [vmem:[#allocation5] sm:$0x1] %vm34_vm0, %v44_v12 }
  0x2d   :  { %97 = shalt.err (!%p94_p12)
}
  0x2e   :  { %s98_s23 = scalar_lea.hbm %s153_s1, 16 }
  0x2f   :  { %p99_p13 = scmp.ne.s32.totalorder %s153_s1, %s98_s23  ;;  %p102_p0 = scmp.lt.u32.totalorder %s98_s23, %s153_s1 }
  0x31   :  { %p104_p1 = pnand %p102_p0, %p99_p13 }
  0x33   :  { %107 = shalt.err (!%p104_p1)
}
  0x34   :  { %55 = dma.vmem_to_hbm [thread:$0]  %s53_s18, 16, %s153_s1, [#allocation4]  }
  0x35   :  { %110 = dma.done.wait [#allocation4], 16  }
  0x36   :  { %111 = vsyncadd [#allocation4], 4294967280 }
  0x37   :  { %59 = vsyncpa [#allocation3], 1 }
  0x38   :  { %60 = vsyncpa [#allocation4], 1 }

</bundles_post_ra>
